<compile_context>
chip_gen: v5e
topology: v5e:2x2
jax: 0.10.0
libtpu: 0.0.40
codegen_flags: <defaults>
</compile_context>

<pallas_src>
import jax
import jax.numpy as jnp
from jax.experimental import pallas as pl
from jax.experimental.pallas import tpu as pltpu


def _make_dense_tanh_kernel(compute_dtype):
    def dense_tanh_kernel(x_ref, w_ref, b_ref, o_ref):
        x = x_ref[...]
        w = w_ref[...]
        if compute_dtype is not None:
            # In-kernel operand cast (v6e/v7x MXU bf16 path); avoids an extra
            # wrapper-side HBM read+write pass over the activations.
            x = x.astype(compute_dtype)
            w = w.astype(compute_dtype)
        # Whole reduction (K = 2H) in one MXU call, f32 accumulation.
        acc = jnp.dot(x, w, preferred_element_type=jnp.float32)
        acc = acc + b_ref[...]              # bias VMEM-resident f32 [1, out_f]
        o_ref[...] = jnp.tanh(acc).astype(o_ref.dtype)
    return dense_tanh_kernel


def custom_dense(x, w, b, *, compute_dtype=None, tile_m=512):
    """x: [B, 2H] f32, w: [2H, H] f32, b: [H] f32 -> [B, H] f32.

    compute_dtype: optional matmul operand dtype (e.g. jnp.bfloat16 on
    v6e/v7x), cast inside the kernel; accumulation / bias / tanh stay f32.
    Leave None on v5e and for exact parity with the PyTorch module.
    """
    B, in_f = x.shape
    in_f_w, out_f = w.shape
    assert in_f == in_f_w and b.shape == (out_f,)

    # Sublane granularity: 8 is enough for the f32 path, 16 for the bf16 path.
    SUB = 8 if compute_dtype is None else 16

    def rup(v, m):
        return ((v + m - 1) // m) * m

    tm = rup(min(tile_m, rup(B, SUB)), SUB)
    # Prefer >=2 grid steps when the batch is big enough to split, so the
    # second TensorCore on v7x has work (no-op effect on v5e/v6e).
    if pl.cdiv(B, tm) < 2 and B >= 2 * 128:
        tm = rup(pl.cdiv(B, 2), SUB)
    grid_m = pl.cdiv(B, tm)

    b2d = b.reshape(1, out_f).astype(jnp.float32)

    cost = pl.CostEstimate(
        flops=2 * B * in_f * out_f,
        transcendentals=B * out_f,                    # tanh per output element
        bytes_accessed=int(x.size * x.dtype.itemsize
                           + w.size * w.dtype.itemsize
                           + b2d.size * 4
                           + B * out_f * x.dtype.itemsize),
    )

    out = pl.pallas_call(
        _make_dense_tanh_kernel(compute_dtype),
        out_shape=jax.ShapeDtypeStruct((B, out_f), x.dtype),
        grid_spec=pltpu.PrefetchScalarGridSpec(
            num_scalar_prefetch=0,
            grid=(grid_m,),
            in_specs=[
                # Activations stream one M-tile per grid step (double-buffered);
                # last dim equals the full array dim, so no padding needed.
                pl.BlockSpec((tm, in_f), lambda i: (i, 0)),
                # Weights + bias: constant index_map -> DMA'd once, VMEM-resident.
                pl.BlockSpec((in_f, out_f), lambda i: (0, 0)),
                pl.BlockSpec((1, out_f), lambda i: (0, 0)),
            ],
            # Narrow (out_f-wide) output: equals full array dim (legal) and cuts
            # HBM write traffic 4x vs a 128-lane padded buffer; masked vst.msk
            # stores are cheaper than the extra bytes in this mem-bound regime.
            out_specs=pl.BlockSpec((tm, out_f), lambda i: (i, 0)),
        ),
        compiler_params=pltpu.CompilerParams(
            # Batch tiles are independent -> megacore sharding on v7x.
            dimension_semantics=("parallel",),
            # Tiles are tiny (tm<=2048 x 64 f32 ~ 0.5 MB); well inside scoped
            # VMEM on every generation incl. v7x (64 MiB physical).
            vmem_limit_bytes=32 * 1024 * 1024,
        ),
        cost_estimate=cost,
    )(x, w, b2d)

    return out


if __name__ == "__main__":
    hidden_size = 32
    batch = 8
    in_features = hidden_size * 2  # 64

    key = jax.random.PRNGKey(0)
    kx, kw, kb = jax.random.split(key, 3)

    # Deterministic params (emulates nn.Linear's uniform init range).
    bound = 1.0 / jnp.sqrt(in_features)
    x = jax.random.normal(kx, (batch, in_features), dtype=jnp.float32)
    w = jax.random.uniform(kw, (in_features, hidden_size), dtype=jnp.float32,
                           minval=-bound, maxval=bound)
    b = jax.random.uniform(kb, (hidden_size,), dtype=jnp.float32,
                           minval=-bound, maxval=bound)

    # f32 path: matches the PyTorch module's semantics exactly.
    out = custom_dense(x, w, b)
    jax.block_until_ready(out)
    ref = jnp.tanh(x @ w + b)
    assert out.shape == (batch, hidden_size)
    assert jnp.allclose(out, ref, atol=1e-5, rtol=1e-5)

    # bf16-operand path (v6e/v7x MXU rate), cast done inside the kernel;
    # f32 accumulation + epilogue.
    out_bf16 = custom_dense(x, w, b, compute_dtype=jnp.bfloat16)
    jax.block_until_ready(out_bf16)
    ref_bf16 = jnp.tanh(
        jnp.dot(x.astype(jnp.bfloat16), w.astype(jnp.bfloat16),
                preferred_element_type=jnp.float32) + b)
    assert jnp.allclose(out_bf16, ref_bf16, atol=2e-2, rtol=2e-2)

    print("KERNEL_OK")
</pallas_src>

<mosaic_0001>
module attributes {stable_mosaic.version = 11 : i64} {
  func.func @dense_tanh_kernel(%arg0: i32, %arg1: memref<8x64xf32, #tpu.memory_space<vmem>>, %arg2: memref<64x32xf32, #tpu.memory_space<vmem>>, %arg3: memref<1x32xf32, #tpu.memory_space<vmem>>, %arg4: memref<8x32xf32, #tpu.memory_space<vmem>>) attributes {dimension_semantics = [#tpu.dimension_semantics<parallel>], iteration_bounds = array<i64: 1>, scalar_prefetch = 0 : i64, scratch_operands = 0 : i64, tpu.core_type = #tpu.core_type<tc>, window_params = [{transform_indices = @transform_0, window_bounds = array<i64: 8, 64>}, {pipeline_mode = #tpu.pipeline_mode<synchronous>, transform_indices = @transform_1, window_bounds = array<i64: 64, 32>}, {pipeline_mode = #tpu.pipeline_mode<synchronous>, transform_indices = @transform_2, window_bounds = array<i64: 1, 32>}, {transform_indices = @transform_3, window_bounds = array<i64: 8, 32>}]} {
    %c0 = arith.constant 0 : index
    %c0_0 = arith.constant 0 : index
    %0 = vector.load %arg1[%c0, %c0_0] : memref<8x64xf32, #tpu.memory_space<vmem>>, vector<8x64xf32>
    %c0_1 = arith.constant 0 : index
    %c0_2 = arith.constant 0 : index
    %1 = vector.load %arg2[%c0_1, %c0_2] : memref<64x32xf32, #tpu.memory_space<vmem>>, vector<64x32xf32>
    %cst = arith.constant dense<0.000000e+00> : vector<8x32xf32>
    %2 = tpu.matmul %0, %1, %cst {dimension_numbers = #tpu.dot_dimension_numbers<[1], [0], [0], [1], [0, 0, 1, 1], [], []>} : vector<8x64xf32>, vector<64x32xf32>, vector<8x32xf32> -> vector<8x32xf32>
    %c0_3 = arith.constant 0 : index
    %c0_4 = arith.constant 0 : index
    %3 = vector.load %arg3[%c0_3, %c0_4] : memref<1x32xf32, #tpu.memory_space<vmem>>, vector<1x32xf32>
    %4 = vector.broadcast %3 : vector<1x32xf32> to vector<8x32xf32>
    %5 = arith.addf %2, %4 : vector<8x32xf32>
    %6 = math.tanh %5 : vector<8x32xf32>
    %c0_5 = arith.constant 0 : index
    %c0_6 = arith.constant 0 : index
    %7 = vector.load %arg4[%c0_5, %c0_6] : memref<8x32xf32, #tpu.memory_space<vmem>>, vector<8x32xf32>
    tpu.vector_store %arg4[%c0_5, %c0_6], %6 {strides = array<i32>} : memref<8x32xf32, #tpu.memory_space<vmem>>, vector<8x32xf32>,
    return
  }
  func.func @transform_0(%arg0: i32) -> (i32, i32) {
    %c0_i32 = arith.constant 0 : i32
    %c0_i32_0 = arith.constant 0 : i32
    return %arg0, %c0_i32 : i32, i32
  }
  func.func @transform_1(%arg0: i32) -> (i32, i32) {
    %c0_i32 = arith.constant 0 : i32
    %c0_i32_0 = arith.constant 0 : i32
    %c0_i32_1 = arith.constant 0 : i32
    return %c0_i32, %c0_i32_0 : i32, i32
  }
  func.func @transform_2(%arg0: i32) -> (i32, i32) {
    %c0_i32 = arith.constant 0 : i32
    %c0_i32_0 = arith.constant 0 : i32
    %c0_i32_1 = arith.constant 0 : i32
    return %c0_i32, %c0_i32_0 : i32, i32
  }
  func.func @transform_3(%arg0: i32) -> (i32, i32) {
    %c0_i32 = arith.constant 0 : i32
    %c0_i32_0 = arith.constant 0 : i32
    return %arg0, %c0_i32 : i32, i32
  }
}

</mosaic_0001>

<bundles_post_ra>
// kernel: tpu_custom_call.1
= control target key start
LH: loop header
LB: loop body
LE: loop exit
PB: predicated region body
PF: predicated region fallthrough
CT: control target
= control target key end

     0   :  { %s156_s0 = inlined_call_operand.vmem [shape: f32[8,64], index: 0, kind: input, shape index: {}]   ;;  %s157_s1 = inlined_call_operand.vmem [shape: f32[64,32], index: 1, kind: input, shape index: {}]   ;;  %s158_s2 = inlined_call_operand.vmem [shape: f32[1,32], index: 2, kind: input, shape index: {}]   ;;  %s159_s3 = inlined_call_operand.hbm [shape: f32[8,32], index: 3, kind: output, shape index: {}]  }
   0x1   :  { %v23_v0 = vld [vmem:[%s157_s1 + $0x38] sm:$0xff]  ;;  %v22_v1 = vld [vmem:[%s157_s1 + $0x30] sm:$0xff]  ;;  %v21_v2 = vld [vmem:[%s157_s1 + $0x28] sm:$0xff] }
   0x2   :  { %40 = vmatpush.msra.mxu0 %v23_v0 }
   0x4   :  { %41 = vmatpush.msra.mxu0 %v22_v1 }
   0x5   :  { %8 = vsyncpa [#allocation3], 0  ;;  %v20_v3 = vld [vmem:[%s157_s1 + $0x20] sm:$0xff]  ;;  %v19_v4 = vld [vmem:[%s157_s1 + $0x18] sm:$0xff]  ;;  %vm28_vm0 = vcmask 523264   ;;  %s102_s5 = smov [#allocation2]  }
   0x6   :  { %42 = vmatpush.msra.mxu0 %v21_v2  ;;  %v18_v5 = vld [vmem:[%s157_s1 + $0x10] sm:$0xff]  ;;  %v17_v6 = vld [vmem:[%s157_s1 + $0x8] sm:$0xff]  ;;  %v16_v7 = vld [vmem:[%s157_s1] sm:$0xff]  ;;  %s60_s6 = sshll.u32 %s102_s5, 4  ;;  %s62_s1 = sshll.u32 %s159_s3, 4  ;;  %vm53_vm1 = vcmask 261120   ;;  %s61_s6 = int_to_ptr.vmem [resolvable:$true] %s60_s6  ;;  %s63_s1 = int_to_ptr.hbm [resolvable:$true] %s62_s1 }
   0x7   :  { %v15_v8 = vld [vmem:[%s156_s0] sm:$0xff] }
   0x8   :  { %43 = vmatpush.msra.mxu0 %v20_v3  ;;  %v73_v9 = vld [vmem:[%s158_s2] ss:$0 sm:$0xff] }
   0xa   :  { %44 = vmatpush.msra.mxu0 %v19_v4 }
   0xc   :  { %45 = vmatpush.msra.mxu0 %v18_v5 }
   0xe   :  { %46 = vmatpush.msra.mxu0 %v17_v6 }
  0x10   :  { %47 = vmatpush.msra.mxu0 %v16_v7 }
  0x11   :  { %71 = vmatmul.msk.f32.vlgmr.msra.gmra.mxu0 %vm28_vm0, %v15_v8 }
  0x8e   :  { %v49_v10 = vpop.f32.mrf.mxu0 }
  0x8f   :  { %v50_v11 = vadd.f32 %v73_v9, %v49_v10 }
  0x91   :  { %74 = vtanh.f32 %v50_v11 }
  0x97   :  { %v75_v12 = vpop.eup %74 }
  0x98   :  { %54 = vst.msk [vmem:[#allocation2] sm:$0xff] %vm53_vm1, %v75_v12 }
  0x99   :  { %65 = dma.vmem_to_hbm [thread:$0]  %s61_s6, 128, %s63_s1, [#allocation3]  }
  0x9a   :  { %100 = dma.done.wait [#allocation3], 128  }
  0x9b   :  { %101 = vsyncadd [#allocation3], 4294967168 }
  0x9c   :  { %70 = vsyncpa [#allocation3], 1 }

</bundles_post_ra>
